<compile_context>
chip_gen: v6e
topology: v6e:2x2x1
jax: 0.10.0
libtpu: 0.0.40
codegen_flags: <defaults>
</compile_context>

<pallas_src>
import functools

import jax
import jax.numpy as jnp
from jax.experimental import pallas as pl
from jax.experimental.pallas import tpu as pltpu


def _round_up(x, m):
    return ((x + m - 1) // m) * m


def _vmem_capacity_bytes():
    try:
        return int(pltpu.get_tpu_info().vmem_capacity_bytes)
    except Exception:
        return 64 << 20  # conservative default (v7x per-TensorCore VMEM)


# --------------------------------------------------------------------------- #
# Kernels
# --------------------------------------------------------------------------- #
def _ffn_resident_kernel(x_ref, w1_ref, b1_ref, w2_ref, b2_ref, o_ref):
    # x_ref: (tm, d)  w1_ref: (d, h_pad)  b1_ref: (1, h_pad)
    # w2_ref: (h_pad, d)  b2_ref: (1, d)  o_ref: (tm, d)
    x = x_ref[...].astype(w1_ref.dtype)            # bf16 MXU path for bf16 weights
    h = jnp.dot(x, w1_ref[...], preferred_element_type=jnp.float32)
    h = jnp.maximum(h + b1_ref[...].astype(jnp.float32), 0.0)   # bias + ReLU in f32
    # dropout (eval mode) -> identity
    out = jnp.dot(h.astype(w2_ref.dtype), w2_ref[...],
                  preferred_element_type=jnp.float32)
    o_ref[...] = (out + b2_ref[...].astype(jnp.float32)).astype(o_ref.dtype)


def _ffn_chunked_kernel(x_ref, w1_ref, b1_ref, w2_ref, b2_ref, o_ref, acc_ref):
    # Streams hidden chunks along grid axis 1 ("arbitrary"); accumulates the
    # second matmul into an f32 scratch; finalizes with b2 on the last chunk.
    k = pl.program_id(1)

    @pl.when(k == 0)
    def _():
        acc_ref[...] = jnp.zeros_like(acc_ref)

    x = x_ref[...].astype(w1_ref.dtype)
    h = jnp.dot(x, w1_ref[...], preferred_element_type=jnp.float32)
    h = jnp.maximum(h + b1_ref[...].astype(jnp.float32), 0.0)
    acc_ref[...] += jnp.dot(h.astype(w2_ref.dtype), w2_ref[...],
                            preferred_element_type=jnp.float32)

    @pl.when(k == pl.num_programs(1) - 1)
    def _():
        o_ref[...] = (acc_ref[...] + b2_ref[...].astype(jnp.float32)).astype(o_ref.dtype)


# --------------------------------------------------------------------------- #
# Wrapper
# --------------------------------------------------------------------------- #
@functools.partial(jax.jit, static_argnames=("tm", "mode", "th"))
def positionwise_ffn(x, w1, b1, w2, b2, *, tm=512, mode="auto", th=2048):
    """x: (batch, seq, d_model) -> (batch, seq, d_model).

    w1: (d_model, hidden), b1: (hidden,), w2: (hidden, d_model), b2: (d_model,)
    mode: "auto" | "resident" | "chunked"; th = hidden chunk for chunked mode.
    """
    batch, seq, d_model = x.shape
    hidden = w1.shape[1]
    M = batch * seq

    x_bytes = jnp.dtype(x.dtype).itemsize
    w_bytes = jnp.dtype(w1.dtype).itemsize
    b_bytes = 4

    # bf16 packs 2 rows per sublane -> keep row tiles 16-aligned (8 for f32).
    row_mult = 8 * max(1, 4 // x_bytes)

    # Row tile: no host-side row padding; Pallas handles the ragged last tile.
    tm_eff = min(tm, _round_up(M, row_mult))
    # >=2 grid steps so the "parallel" row axis can shard across both v7x
    # TensorCores (harmless extra step on 1-TC v5e/v6e).
    if M > row_mult and pl.cdiv(M, tm_eff) < 2:
        tm_eff = max(row_mult, _round_up(pl.cdiv(M, 2), row_mult))

    vmem_cap = _vmem_capacity_bytes()
    budget = vmem_cap - (6 << 20)            # headroom for Mosaic scratch

    h_pad = _round_up(hidden, 128)           # lane-align hidden (weights-only pad)

    def resident_footprint(tm_):
        resident = 2 * d_model * h_pad * w_bytes + (h_pad + d_model) * b_bytes
        streamed = 2 * 2 * tm_ * d_model * x_bytes          # x + out, double-buffered
        interm = tm_ * h_pad * (4 + w_bytes)                # f32 h + cast copy
        return resident + streamed + interm

    def chunked_footprint(tm_, th_):
        w_stream = 2 * (2 * d_model * th_ * w_bytes + th_ * b_bytes)  # W1/W2/b1 chunks x2 bufs
        resident = d_model * b_bytes                                  # b2
        streamed = 2 * 2 * tm_ * d_model * x_bytes
        acc = tm_ * d_model * 4
        interm = tm_ * th_ * (4 + w_bytes)
        return w_stream + resident + streamed + acc + interm

    use_chunked = (mode == "chunked")
    if mode == "auto":
        while resident_footprint(tm_eff) > budget and tm_eff > 128:
            tm_eff = max(128, _round_up(tm_eff // 2, row_mult))
        use_chunked = resident_footprint(tm_eff) > budget

    th_eff = None
    if use_chunked:
        th_eff = min(_round_up(th, 128), _round_up(hidden, 128))
        while chunked_footprint(tm_eff, th_eff) > budget:
            if th_eff > 512:
                th_eff = max(512, _round_up(th_eff // 2, 128))
            elif tm_eff > 128:
                tm_eff = max(128, _round_up(tm_eff // 2, row_mult))
            elif th_eff > 128:
                th_eff = max(128, _round_up(th_eff // 2, 128))
            else:
                break
        h_pad = _round_up(hidden, th_eff)    # whole number of hidden chunks
        footprint = chunked_footprint(tm_eff, th_eff)
    else:
        footprint = resident_footprint(tm_eff)

    vmem_limit = int(min(max(int(1.2 * footprint) + (2 << 20), 32 << 20),
                         max(vmem_cap - (4 << 20), 32 << 20)))

    # Weights-only padding along hidden (zero pads are mathematically neutral:
    # ReLU(0 + 0) = 0 contributes nothing through W2's zero rows).
    pad_h = h_pad - hidden
    if pad_h:
        w1p = jnp.pad(w1, ((0, 0), (0, pad_h)))
        w2p = jnp.pad(w2, ((0, pad_h), (0, 0)))
        b1p = jnp.pad(b1, (0, pad_h))
    else:
        w1p, w2p, b1p = w1, w2, b1
    b1p = b1p.reshape(1, h_pad)
    b2p = b2.reshape(1, d_model)
    x2d = x.reshape(M, d_model)

    n_rows = pl.cdiv(M, tm_eff)
    flops = 4 * M * d_model * h_pad
    if use_chunked:
        n_h = h_pad // th_eff
        bytes_accessed = (M * d_model * x_bytes * (n_h + 1)
                          + 2 * d_model * h_pad * w_bytes
                          + (h_pad + d_model) * b_bytes)
    else:
        bytes_accessed = (2 * M * d_model * x_bytes
                          + 2 * d_model * h_pad * w_bytes
                          + (h_pad + d_model) * b_bytes)
    cost = pl.CostEstimate(flops=int(flops), transcendentals=0,
                           bytes_accessed=int(bytes_accessed))

    single = pl.Buffered(1)   # constant index_map -> no benefit from 2x buffering

    if not use_chunked:
        out2d = pl.pallas_call(
            _ffn_resident_kernel,
            out_shape=jax.ShapeDtypeStruct((M, d_model), x.dtype),
            grid_spec=pltpu.PrefetchScalarGridSpec(
                num_scalar_prefetch=0,
                grid=(n_rows,),
                in_specs=[
                    pl.BlockSpec((tm_eff, d_model), lambda i: (i, 0)),     # x tile
                    pl.BlockSpec((d_model, h_pad), lambda i: (0, 0),
                                 pipeline_mode=single),                    # W1 (resident)
                    pl.BlockSpec((1, h_pad), lambda i: (0, 0),
                                 pipeline_mode=single),                    # b1
                    pl.BlockSpec((h_pad, d_model), lambda i: (0, 0),
                                 pipeline_mode=single),                    # W2 (resident)
                    pl.BlockSpec((1, d_model), lambda i: (0, 0),
                                 pipeline_mode=single),                    # b2
                ],
                out_specs=pl.BlockSpec((tm_eff, d_model), lambda i: (i, 0)),
            ),
            compiler_params=pltpu.CompilerParams(
                dimension_semantics=("parallel",),
                vmem_limit_bytes=vmem_limit),
            cost_estimate=cost,
        )(x2d, w1p, b1p, w2p, b2p)
    else:
        n_h = h_pad // th_eff
        out2d = pl.pallas_call(
            _ffn_chunked_kernel,
            out_shape=jax.ShapeDtypeStruct((M, d_model), x.dtype),
            grid_spec=pltpu.PrefetchScalarGridSpec(
                num_scalar_prefetch=0,
                grid=(n_rows, n_h),
                in_specs=[
                    pl.BlockSpec((tm_eff, d_model), lambda i, k: (i, 0)),  # x tile
                    pl.BlockSpec((d_model, th_eff), lambda i, k: (0, k)),  # W1 chunk
                    pl.BlockSpec((1, th_eff), lambda i, k: (0, k)),        # b1 chunk
                    pl.BlockSpec((th_eff, d_model), lambda i, k: (k, 0)),  # W2 chunk
                    pl.BlockSpec((1, d_model), lambda i, k: (0, 0),
                                 pipeline_mode=single),                    # b2
                ],
                out_specs=pl.BlockSpec((tm_eff, d_model), lambda i, k: (i, 0)),
                scratch_shapes=[pltpu.VMEM((tm_eff, d_model), jnp.float32)],
            ),
            compiler_params=pltpu.CompilerParams(
                dimension_semantics=("parallel", "arbitrary"),
                vmem_limit_bytes=vmem_limit),
            cost_estimate=cost,
        )(x2d, w1p, b1p, w2p, b2p)

    return out2d.reshape(batch, seq, d_model)


def _reference(x, w1, b1, w2, b2):
    h = jnp.maximum(jnp.dot(x, w1) + b1, 0.0)
    return jnp.dot(h, w2) + b2


if __name__ == "__main__":
    batch, seq, d_model, hidden = 2, 8, 32, 64

    key = jax.random.PRNGKey(0)
    kx, k1, k2, k3, k4 = jax.random.split(key, 5)

    x = jax.random.normal(kx, (batch, seq, d_model), dtype=jnp.float32)

    # nn.Linear init bounds (deterministic synthetic params), stored
    # pre-transposed relative to torch's (out, in) layout.
    bound1 = 1.0 / (d_model ** 0.5)
    bound2 = 1.0 / (hidden ** 0.5)
    w1 = jax.random.uniform(k1, (d_model, hidden), minval=-bound1, maxval=bound1,
                            dtype=jnp.float32)
    b1 = jax.random.uniform(k2, (hidden,), minval=-bound1, maxval=bound1,
                            dtype=jnp.float32)
    w2 = jax.random.uniform(k3, (hidden, d_model), minval=-bound2, maxval=bound2,
                            dtype=jnp.float32)
    b2 = jax.random.uniform(k4, (d_model,), minval=-bound2, maxval=bound2,
                            dtype=jnp.float32)

    # 1) default (resident-weight) path
    out = jax.block_until_ready(positionwise_ffn(x, w1, b1, w2, b2))
    ref = _reference(x, w1, b1, w2, b2)
    assert out.shape == (batch, seq, d_model)
    assert jnp.allclose(out, ref, atol=1e-5, rtol=1e-5), "resident path mismatch"

    # 2) exercise the hidden-chunked (v7x large-weight) path at small shape
    hidden2 = 256
    bound2b = 1.0 / (hidden2 ** 0.5)
    w1b = jax.random.uniform(k1, (d_model, hidden2), minval=-bound1, maxval=bound1,
                             dtype=jnp.float32)
    b1b = jax.random.uniform(k2, (hidden2,), minval=-bound1, maxval=bound1,
                             dtype=jnp.float32)
    w2b = jax.random.uniform(k3, (hidden2, d_model), minval=-bound2b, maxval=bound2b,
                             dtype=jnp.float32)
    b2b = jax.random.uniform(k4, (d_model,), minval=-bound2b, maxval=bound2b,
                             dtype=jnp.float32)
    out2 = jax.block_until_ready(
        positionwise_ffn(x, w1b, b1b, w2b, b2b, mode="chunked", th=128))
    ref2 = _reference(x, w1b, b1b, w2b, b2b)
    assert out2.shape == (batch, seq, d_model)
    assert jnp.allclose(out2, ref2, atol=1e-4, rtol=1e-4), "chunked path mismatch"

    print("KERNEL_OK")
</pallas_src>

<mosaic_0001>
module attributes {stable_mosaic.version = 11 : i64} {
  func.func @_ffn_resident_kernel(%arg0: i32, %arg1: memref<8x32xf32, #tpu.memory_space<vmem>>, %arg2: memref<32x128xf32, #tpu.memory_space<vmem>>, %arg3: memref<1x128xf32, #tpu.memory_space<vmem>>, %arg4: memref<128x32xf32, #tpu.memory_space<vmem>>, %arg5: memref<1x32xf32, #tpu.memory_space<vmem>>, %arg6: memref<8x32xf32, #tpu.memory_space<vmem>>) attributes {dimension_semantics = [#tpu.dimension_semantics<parallel>], iteration_bounds = array<i64: 2>, scalar_prefetch = 0 : i64, scratch_operands = 0 : i64, tpu.core_type = #tpu.core_type<tc>, window_params = [{transform_indices = @transform_0, window_bounds = array<i64: 8, 32>}, {pipeline_mode = #tpu.pipeline_mode<synchronous>, transform_indices = @transform_1, window_bounds = array<i64: 32, 128>}, {pipeline_mode = #tpu.pipeline_mode<synchronous>, transform_indices = @transform_2, window_bounds = array<i64: 1, 128>}, {pipeline_mode = #tpu.pipeline_mode<synchronous>, transform_indices = @transform_3, window_bounds = array<i64: 128, 32>}, {pipeline_mode = #tpu.pipeline_mode<synchronous>, transform_indices = @transform_4, window_bounds = array<i64: 1, 32>}, {transform_indices = @transform_5, window_bounds = array<i64: 8, 32>}]} {
    %c0 = arith.constant 0 : index
    %c0_0 = arith.constant 0 : index
    %0 = vector.load %arg1[%c0, %c0_0] : memref<8x32xf32, #tpu.memory_space<vmem>>, vector<8x32xf32>
    %c0_1 = arith.constant 0 : index
    %c0_2 = arith.constant 0 : index
    %1 = vector.load %arg2[%c0_1, %c0_2] : memref<32x128xf32, #tpu.memory_space<vmem>>, vector<32x128xf32>
    %cst = arith.constant dense<0.000000e+00> : vector<8x128xf32>
    %2 = tpu.matmul %0, %1, %cst {dimension_numbers = #tpu.dot_dimension_numbers<[1], [0], [0], [1], [0, 0, 1, 1], [], []>} : vector<8x32xf32>, vector<32x128xf32>, vector<8x128xf32> -> vector<8x128xf32>
    %c0_3 = arith.constant 0 : index
    %c0_4 = arith.constant 0 : index
    %3 = vector.load %arg3[%c0_3, %c0_4] : memref<1x128xf32, #tpu.memory_space<vmem>>, vector<1x128xf32>
    %4 = vector.broadcast %3 : vector<1x128xf32> to vector<8x128xf32>
    %5 = arith.addf %2, %4 : vector<8x128xf32>
    %cst_5 = arith.constant 0.000000e+00 : f32
    %6 = vector.broadcast %cst_5 : f32 to vector<8x128xf32>
    %7 = arith.maximumf %5, %6 : vector<8x128xf32>
    %c0_6 = arith.constant 0 : index
    %c0_7 = arith.constant 0 : index
    %8 = vector.load %arg4[%c0_6, %c0_7] : memref<128x32xf32, #tpu.memory_space<vmem>>, vector<128x32xf32>
    %cst_8 = arith.constant dense<0.000000e+00> : vector<8x32xf32>
    %9 = tpu.matmul %7, %8, %cst_8 {dimension_numbers = #tpu.dot_dimension_numbers<[1], [0], [0], [1], [0, 0, 1, 1], [], []>} : vector<8x128xf32>, vector<128x32xf32>, vector<8x32xf32> -> vector<8x32xf32>
    %c0_9 = arith.constant 0 : index
    %c0_10 = arith.constant 0 : index
    %10 = vector.load %arg5[%c0_9, %c0_10] : memref<1x32xf32, #tpu.memory_space<vmem>>, vector<1x32xf32>
    %11 = vector.broadcast %10 : vector<1x32xf32> to vector<8x32xf32>
    %12 = arith.addf %9, %11 : vector<8x32xf32>
    %c0_11 = arith.constant 0 : index
    %c0_12 = arith.constant 0 : index
    %13 = vector.load %arg6[%c0_11, %c0_12] : memref<8x32xf32, #tpu.memory_space<vmem>>, vector<8x32xf32>
    tpu.vector_store %arg6[%c0_11, %c0_12], %12 {strides = array<i32>} : memref<8x32xf32, #tpu.memory_space<vmem>>, vector<8x32xf32>,
    return
  }
  func.func @transform_0(%arg0: i32) -> (i32, i32) {
    %c0_i32 = arith.constant 0 : i32
    %c0_i32_0 = arith.constant 0 : i32
    return %arg0, %c0_i32 : i32, i32
  }
  func.func @transform_1(%arg0: i32) -> (i32, i32) {
    %c0_i32 = arith.constant 0 : i32
    %c0_i32_0 = arith.constant 0 : i32
    %c0_i32_1 = arith.constant 0 : i32
    return %c0_i32, %c0_i32_0 : i32, i32
  }
  func.func @transform_2(%arg0: i32) -> (i32, i32) {
    %c0_i32 = arith.constant 0 : i32
    %c0_i32_0 = arith.constant 0 : i32
    %c0_i32_1 = arith.constant 0 : i32
    return %c0_i32, %c0_i32_0 : i32, i32
  }
  func.func @transform_3(%arg0: i32) -> (i32, i32) {
    %c0_i32 = arith.constant 0 : i32
    %c0_i32_0 = arith.constant 0 : i32
    %c0_i32_1 = arith.constant 0 : i32
    return %c0_i32, %c0_i32_0 : i32, i32
  }
  func.func @transform_4(%arg0: i32) -> (i32, i32) {
    %c0_i32 = arith.constant 0 : i32
    %c0_i32_0 = arith.constant 0 : i32
    %c0_i32_1 = arith.constant 0 : i32
    return %c0_i32, %c0_i32_0 : i32, i32
  }
  func.func @transform_5(%arg0: i32) -> (i32, i32) {
    %c0_i32 = arith.constant 0 : i32
    %c0_i32_0 = arith.constant 0 : i32
    return %arg0, %c0_i32 : i32, i32
  }
}

</mosaic_0001>

<bundles_post_ra>
// kernel: positionwise_ffn.1
= control target key start
LH: loop header
LB: loop body
LE: loop exit
PB: predicated region body
PF: predicated region fallthrough
CT: control target
= control target key end

     0   :  { %10 = vsyncpa [#allocation3], 0  ;;  %s876_s0 = inlined_call_operand.vmem [shape: f32[16,32], index: 0, kind: input, shape index: {}]   ;;  %s877_s1 = inlined_call_operand.vmem [shape: f32[32,128], index: 1, kind: input, shape index: {}]   ;;  %s878_s2 = inlined_call_operand.vmem [shape: f32[1,128], index: 2, kind: input, shape index: {}]   ;;  %s879_s3 = inlined_call_operand.vmem [shape: f32[128,32], index: 3, kind: input, shape index: {}]   ;;  %s880_s4 = inlined_call_operand.vmem [shape: f32[1,32], index: 4, kind: input, shape index: {}]   ;;  %s881_s5 = inlined_call_operand.hbm [shape: f32[16,32], index: 5, kind: output, shape index: {}]  }
   0x1   :  { %12 = vsyncpa [#allocation3 + $0x1], 0  ;;  %s691_s18 = smov 0   ;;  %s693_s19 = smov 0  }
   0x2   :  { %s695_s20 = smov 0   ;;  %s697_s21 = smov 0  }
   0x3 LB: > { %s712_s22 = sadd.s32 4294967295, %s656_s21   ;;  %s474_s23 = sadd.s32 4294967294, %s656_s21   ;;  %s656_s21 = sphi %s697_s21, %s887_s21   ;;  %s652_s20 = sphi %s695_s20, %s886_s20   ;;  %s648_s19 = sphi %s693_s19, %s885_s19   ;;  %s644_s18 = sphi %s691_s18, %s884_s18  }
   0x4   : > { %s716_s24 = sadd.s32 1, %s656_s21   ;;  %s135_s25 = sadd.s32 1, %s652_s20 }
   0x5   : > { %s132_s26 = ssub.s32 %s656_s21, %s716_s24  ;;  %p145_p0 = scmp.ne.s32.totalorder %s652_s20, %s648_s19 }
   0x6   : > { %p133_p1 = scmp.eq.s32.totalorder %s132_s26, 0  ;;  %p146_p2 = scmp.eq.s32.totalorder %s712_s22, 1 }
   0x7   : > { %p151_p3 = scmp.ne.s32.totalorder %s648_s19, %s644_s18  ;;  %p152_p4 = scmp.eq.s32.totalorder %s474_s23, 1 }
   0x8   : > { %s727_s27 = scalar_select %p133_p1, %s652_s20, %s135_s25  }
   0x9   : > { %p729_p5 = por %p146_p2, %p145_p0  ;;  %p733_p6 = por %p152_p4, %p151_p3 }
   0xa   : > { %p477_p7 = scmp.ge.s32.totalorder %s656_s21, 1  ;;  %p189_p8 = scmp.lt.s32.totalorder %s656_s21, 3 }
   0xc   : > { %p190_p9 = pnand %p477_p7, %p189_p8 }
   0xd   : > { %p216_p10 = scmp.lt.s32.totalorder (!%p190_p9), %s712_s22, 1  ;;  %s213_s26 = sand.u32 (!%p190_p9), 1, %s648_s19  }
   0xe   : > { %193 = sbr.rel (%p190_p9) target bundleno = 433 (0x1b1), region = 40  ;;  %s478_s30 = sshll.u32 (!%p190_p9), %s213_s26, 3 }
   0xf   : > { %s484_s8 = sshll.u32 (!%p190_p9), %s712_s22, 7  ;;  %s215_s9 = scalar_lea.vmem (!%p190_p9), [#allocation2], %s478_s30 }
  0x10   : > { %s415_s10 = sshll.u32 (!%p190_p9), %s215_s9, 4  ;;  %s840_s13 = scalar_lea.hbm (!%p190_p9), %s881_s5, %s484_s8  ;;  %s416_s10 = int_to_ptr.vmem [resolvable:$true] %s415_s10 }
  0x11   : > { %s402_s14 = scalar_lea.sflag (!%p190_p9), [#allocation3], %s213_s26  ;;  %s596_s15 = scalar_lea.vmem (!%p190_p9), %s416_s10, 128 }
  0x12   : > { %p597_p11 = scmp.ne.s32.totalorder (!%p190_p9), %s416_s10, %s596_s15 }
  0x13   : > { %v224_v0 = vld [vmem:[%s877_s1 + $0x18] sm:$0xff]  ;;  %v658_v1 = vmov 0.0   ;;  %v223_v2 = vld [vmem:[%s877_s1 + $0x10] sm:$0xff]  ;;  %vm659_vm0 = vmmov 0   ;;  %s217_s11 = scalar_select %p216_p10, %s712_s22, 1  ;;  %v222_v5 = vld [vmem:[%s877_s1 + $0x8] sm:$0xff] }
  0x14   : > { %509 = vmatprep.subr.mxu0 %v658_v1  ;;  %517 = vmatprep.mubr.msk.f32.mxu0 %vm659_vm0, %v658_v1  ;;  %v322_v3 = vld [vmem:[%s879_s3 + $0x78] sm:$0xff]  ;;  %v321_v4 = vld [vmem:[%s879_s3 + $0x70] sm:$0xff]  ;;  %v320_v6 = vld [vmem:[%s879_s3 + $0x68] sm:$0xff]  ;;  %vm232_vm1 = vcmask 261120   ;;  %p598_p12 = pnand %p597_p11, %p729_p5  ;;  %s660_s22 = smov [#allocation2]  }
  0x15   : > { %510 = vmatpush3.msra.mxu0 %v224_v0  ;;  %520 = vmatprep.subr.mxu1 %v658_v1  ;;  %s479_s16 = sshll.u32 %s217_s11, 3  ;;  %v221_v7 = vld [vmem:[%s877_s1] sm:$0xff]  ;;  %v318_v10 = vld [vmem:[%s879_s3 + $0x58] sm:$0xff]  ;;  %v317_v11 = vld [vmem:[%s879_s3 + $0x50] sm:$0xff] }
  0x16   : > { %511 = vmatprep.subr.mxu0 %v658_v1  ;;  %521 = vmatpush3.msra.mxu1 %v322_v3  ;;  %s219_s7 = scalar_lea.vmem %s876_s0, %s479_s16  ;;  %v319_v9 = vld [vmem:[%s879_s3 + $0x60] sm:$0xff]  ;;  %v316_v12 = vld [vmem:[%s879_s3 + $0x48] sm:$0xff]  ;;  %v314_v14 = vld [vmem:[%s879_s3 + $0x38] sm:$0xff]  ;;  %p599_p13 = pneg %p598_p12 }
  0x17   : > { %512 = vmatpush3.msra.mxu0 %v223_v2  ;;  %522 = vmatprep.subr.mxu1 %v658_v1  ;;  %v220_v8 = vld [vmem:[%s219_s7] sm:$0xff]  ;;  %v313_v15 = vld [vmem:[%s879_s3 + $0x30] sm:$0xff]  ;;  %v312_v16 = vld [vmem:[%s879_s3 + $0x28] sm:$0xff]  ;;  %s600_s16 = sshll.u32 %s660_s22, 4  ;;  %s601_s16 = int_to_ptr.vmem [resolvable:$false] %s600_s16 }
  0x18   : > { %513 = vmatprep.subr.mxu0 %v658_v1  ;;  %523 = vmatpush3.msra.mxu1 %v321_v4  ;;  %v315_v13 = vld [vmem:[%s879_s3 + $0x40] sm:$0xff]  ;;  %v310_v18 = vld [vmem:[%s879_s3 + $0x18] sm:$0xff]  ;;  %v309_v19 = vld [vmem:[%s879_s3 + $0x10] sm:$0xff]  ;;  %s602_s17 = scalar_lea.vmem %s601_s16, 256  ;;  %p603_p0 = scmp.lt.s32.totalorder %s416_s10, %s601_s16 }
  0x19   : > { %514 = vmatpush3.msra.mxu0 %v222_v5  ;;  %524 = vmatprep.subr.mxu1 %v658_v1  ;;  %v311_v17 = vld [vmem:[%s879_s3 + $0x20] sm:$0xff]  ;;  %v308_v20 = vld [vmem:[%s879_s3 + $0x8] sm:$0xff]  ;;  %p604_p1 = scmp.lt.s32.totalorder %s602_s17, %s596_s15 }
  0x1a   : > { %515 = vmatprep.subr.mxu0 %v658_v1  ;;  %525 = vmatpush3.msra.mxu1 %v320_v6  ;;  %v307_v21 = vld [vmem:[%s879_s3] sm:$0xff] }
  0x1b   : > { %516 = vmatpush3.msra.mxu0 %v221_v7  ;;  %526 = vmatprep.subr.mxu1 %v658_v1  ;;  %v480_v22 = vld [vmem:[%s878_s2] ss:$0 sm:$0xff]  ;;  %p605_p2 = por %p604_p1, %p603_p0 }
  0x1c   : > { %518 = vmatmul.mubr.msk.f32.vlgmr.msra.gmra.mxu0 %vm232_vm1, %v220_v8  ;;  %527 = vmatpush3.msra.mxu1 %v319_v9  ;;  %v482_v27 = vld [vmem:[%s880_s4] ss:$0 sm:$0xff] }
  0x1d   : > { %528 = vmatprep.subr.mxu1 %v658_v1  ;;  %552 = vmatprep.mubr.msk.f32.mxu1 %vm659_vm0, %v658_v1  ;;  %p606_p3 = pnand %p605_p2, %p599_p13 }
  0x1e   : > { %529 = vmatpush3.msra.mxu1 %v318_v10 }
  0x1f   : > { %530 = vmatprep.subr.mxu1 %v658_v1 }
  0x20   : > { %531 = vmatpush3.msra.mxu1 %v317_v11 }
  0x21   : > { %532 = vmatprep.subr.mxu1 %v658_v1 }
  0x22   : > { %533 = vmatpush3.msra.mxu1 %v316_v12 }
  0x23   : > { %534 = vmatprep.subr.mxu1 %v658_v1 }
  0x24   : > { %535 = vmatpush3.msra.mxu1 %v315_v13 }
  0x25   : > { %536 = vmatprep.subr.mxu1 %v658_v1 }
  0x26   : > { %537 = vmatpush3.msra.mxu1 %v314_v14 }
  0x27   : > { %538 = vmatprep.subr.mxu1 %v658_v1 }
  0x28   : > { %539 = vmatpush3.msra.mxu1 %v313_v15 }
  0x29   : > { %540 = vmatprep.subr.mxu1 %v658_v1 }
  0x2a   : > { %541 = vmatpush3.msra.mxu1 %v312_v16 }
  0x2b   : > { %542 = vmatprep.subr.mxu1 %v658_v1 }
  0x2c   : > { %543 = vmatpush3.msra.mxu1 %v311_v17 }
  0x2d   : > { %544 = vmatprep.subr.mxu1 %v658_v1 }
  0x2e   : > { %545 = vmatpush3.msra.mxu1 %v310_v18 }
  0x2f   : > { %546 = vmatprep.subr.mxu1 %v658_v1 }
  0x30   : > { %547 = vmatpush3.msra.mxu1 %v309_v19 }
  0x31   : > { %548 = vmatprep.subr.mxu1 %v658_v1 }
  0x32   : > { %549 = vmatpush3.msra.mxu1 %v308_v20 }
  0x33   : > { %550 = vmatprep.subr.mxu1 %v658_v1 }
  0x34   : > { %551 = vmatpush3.msra.mxu1 %v307_v21 }
  0xdc   : > { %v302_v23 = vpop.f32.mrf.mxu0 }
  0xdd   : > { %v303_v24 = vadd.f32 %v480_v22, %v302_v23 }
  0xde   : > { %v519_v25 = vpop.f32.mrf.mxu0 }
  0xdf   : > { %v306_v26 = vmax.f32 %v303_v24, 0.0 }
  0xe1   : > { %553 = vmatmul.mubr.f32.vlgmr.msra.gmra.mxu1 %v306_v26 }
 0x1a1   : > { %v396_v28 = vpop.f32.mrf.mxu1 }
 0x1a2   : > { %v397_v29 = vadd.f32 %v482_v27, %v396_v28 }
 0x1a3   : > { %v554_v30 = vpop.f32.mrf.mxu1 }
 0x1a4   : > { %400 = vst.msk [vmem:[%s215_s9] sm:$0xff] %vm232_vm1, %v397_v29 }
 0x1a5   : > { %609 = shalt.err (!%p606_p3)
}
 0x1a6   : > { %s610_s23 = scalar_lea.hbm %s840_s13, 128  ;;  %s614_s30 = scalar_lea.hbm %s881_s5, 256 }
 0x1a7   : > { %p611_p4 = scmp.ne.s32.totalorder %s840_s13, %s610_s23  ;;  %p615_p9 = scmp.lt.s32.totalorder %s840_s13, %s881_s5 }
 0x1a8   : > { %p616_p10 = scmp.lt.s32.totalorder %s614_s30, %s610_s23 }
 0x1a9   : > { %p612_p7 = pnand %p611_p4, %p729_p5 }
 0x1aa   : > { %p617_p11 = por %p616_p10, %p615_p9 }
 0x1ab   : > { %p613_p8 = pneg %p612_p7 }
 0x1ad   : > { %p618_p12 = pnand %p617_p11, %p613_p8 }
 0x1af   : > { %621 = shalt.err (!%p618_p12)
}
 0x1b0   : > { %555 = dma.vmem_to_hbm [thread:$0]  (%p729_p5), %s416_s10, 128, %s840_s13, %s402_s14  }
 0x1b1 PF: > { %p561_p13 = scmp.ge.s32.totalorder %s656_s21, 2  ;;  %s427_s8 = sand.u32 1, %s644_s18  }
 0x1b2   : > { %s428_s9 = scalar_lea.sflag [#allocation3], %s427_s8 }
 0x1b3   : > { %p558_p0 = pnand %p561_p13, %p733_p6 }
 0x1b5   : > { %p559_p1 = pneg %p558_p0 }
 0x1b7   : > { %639 = dma.done.wait (%p559_p1), %s428_s9, 128  }
 0x1b8   : > { %641 = vsyncadd (%p559_p1), %s428_s9, 4294967168  ;;  %p15_p2 = scmp.ge.s32.totalorder %s716_s24, 4   ;;  %s884_s18 = smov %s648_s19 }
 0x1b9   : > { %s885_s19 = smov %s652_s20  ;;  %s886_s20 = smov %s727_s27 }
 0x1ba   : > { %s887_s21 = smov %s716_s24  ;;  %17 = sbr.rel (!%p15_p2) target bundleno = 3 (0x3), region = 75 }
 0x1bf   :  { %433 = vsyncpa [#allocation3], 1 }
 0x1c0   :  { %435 = vsyncpa [#allocation3 + $0x1], 1 }

</bundles_post_ra>
